<compile_context>
chip_gen: v7x
topology: tpu7x:2x2x1
jax: 0.10.0
libtpu: 0.0.40
codegen_flags: <defaults>
</compile_context>

<pallas_src>
import jax
import jax.numpy as jnp
from jax.experimental import pallas as pl
from jax.experimental.pallas import tpu as pltpu


_LANE = 128  # TPU lane width; final layer is padded to this so the output store is unmasked.


def _myresnext_kernel(x_ref,             # (B, C, S)   f32 image, flattened spatial
                      wb_ref, bb_ref,    # backbone stand-in: (C,1000) bf16 (pre-scaled 1/S), (1,1000) f32
                      w1_ref, b1_ref,    # head L1: (1000,100) bf16, (1,100) f32
                      w2_ref, b2_ref,    # head L2: (100,128) bf16 lane-padded, (1,128) f32
                      out_ref):          # (B, 128) f32 sigmoid probs (lanes >= num_classes unused)
    # Global average pool: the 1/S normalization is folded into wb, so a pure
    # lane-axis sum (XLU slot) suffices here.
    gap = jnp.sum(x_ref[...], axis=-1)                                       # (B, C) f32

    # Backbone stand-in: pooled features -> 1000-dim "pretrained" output.
    feat1000 = jnp.dot(gap.astype(jnp.bfloat16), wb_ref[...],
                       preferred_element_type=jnp.float32) + bb_ref[...]     # (B, 1000) f32

    # my_new_layers: Linear(1000,100) -> ReLU -> Linear(100, num_classes[padded to 128]).
    h = jnp.dot(feat1000.astype(jnp.bfloat16), w1_ref[...],
                preferred_element_type=jnp.float32) + b1_ref[...]            # (B, 100) f32
    h = jnp.maximum(h, 0.0)
    logits = jnp.dot(h.astype(jnp.bfloat16), w2_ref[...],
                     preferred_element_type=jnp.float32) + b2_ref[...]       # (B, 128) f32

    # torch.sigmoid; single lane-dense (unmasked) store of the full 128-lane slab.
    out_ref[...] = jax.nn.sigmoid(logits)


def _vmem_spec():
    # Tiny single-invocation kernel: every operand is a full VMEM-resident block.
    return pl.BlockSpec(memory_space=pltpu.MemorySpace.VMEM)


def myresnext50_forward(x_nchw, params, num_classes=23):
    """x_nchw: (B, C, H, W) float32. Returns pred of shape (B, num_classes),
    matching `torch.sigmoid(my_new_layers(pretrained(x)).reshape(B, num_classes))`."""
    B, C, H, W = x_nchw.shape
    S = H * W
    x_flat = x_nchw.reshape(B, C, S).astype(jnp.float32)       # glue reshape only

    # ---- operand packing (weight-only prep, traced once under jit) --------------------
    # Fold GAP's 1/S into the backbone weight; cast matmul weights to bf16 to halve the
    # weight DMA bytes (biases stay f32 and are added to the f32 accumulator).
    wb = (params["wb"] * (1.0 / S)).astype(jnp.bfloat16)                    # (C, 1000)
    bb = params["bb"].astype(jnp.float32)                                   # (1, 1000)
    w1 = params["w1"].astype(jnp.bfloat16)                                  # (1000, 100)
    b1 = params["b1"].astype(jnp.float32)                                   # (1, 100)
    # Lane-pad the final layer so the kernel's output is a dense (B, 128) slab.
    w2 = jnp.zeros((100, _LANE), jnp.bfloat16).at[:, :num_classes].set(
        params["w2"].astype(jnp.bfloat16))                                  # (100, 128)
    b2 = jnp.zeros((1, _LANE), jnp.float32).at[:, :num_classes].set(
        params["b2"].astype(jnp.float32))                                   # (1, 128)

    args = (x_flat, wb, bb, w1, b1, w2, b2)

    flops = 2 * B * (C * 1000 + 1000 * 100 + 100 * _LANE) + B * C * S
    bytes_accessed = sum(int(a.size) * a.dtype.itemsize for a in args) + B * _LANE * 4
    cost = pl.CostEstimate(flops=flops,
                           transcendentals=B * _LANE,       # sigmoids (EUP)
                           bytes_accessed=bytes_accessed)

    out = pl.pallas_call(
        _myresnext_kernel,
        out_shape=jax.ShapeDtypeStruct((B, _LANE), jnp.float32),
        in_specs=[_vmem_spec() for _ in args],
        out_specs=_vmem_spec(),
        cost_estimate=cost,
    )(*args)

    return out[:, :num_classes]                              # (B, num_classes)


def init_params(key, in_channels, num_classes=23):
    """Deterministic synthetic parameters matching the module's layer shapes.
    PyTorch Linear stores W as (out, in); we store the transpose (in, out)."""
    ks = jax.random.split(key, 6)
    scale = 0.02

    def w(k, shape):
        return (scale * jax.random.normal(k, shape)).astype(jnp.float32)

    return {
        # TODO(synk): stand-in for the external ResNeXt50 backbone (GAP -> Linear(C, 1000)).
        "wb": w(ks[0], (in_channels, 1000)),
        "bb": w(ks[1], (1, 1000)),
        # my_new_layers = Linear(1000, 100) -> ReLU -> Linear(100, num_classes)
        "w1": w(ks[2], (1000, 100)),
        "b1": w(ks[3], (1, 100)),
        "w2": w(ks[4], (100, num_classes)),
        "b2": w(ks[5], (1, num_classes)),
    }


if __name__ == "__main__":
    key = jax.random.PRNGKey(0)
    k_x, k_p = jax.random.split(key)

    B, C, H, W = 2, 4, 16, 16          # small NCHW input, as the PyTorch module expects
    num_classes = 23
    x = jax.random.normal(k_x, (B, C, H, W), dtype=jnp.float32)
    params = init_params(k_p, C, num_classes)

    fwd = jax.jit(myresnext50_forward, static_argnames=("num_classes",))
    pred = fwd(x, params, num_classes=num_classes)
    jax.block_until_ready(pred)

    assert pred.shape == (B, num_classes)
    assert bool(jnp.all((pred >= 0) & (pred <= 1)))

    # Pure-JAX reference of the same math (f32) to sanity-check the bf16-weight kernel.
    gap = jnp.mean(x.reshape(B, C, H * W), axis=-1)
    feat = gap @ params["wb"] + params["bb"]
    h = jnp.maximum(feat @ params["w1"] + params["b1"], 0.0)
    ref = jax.nn.sigmoid(h @ params["w2"] + params["b2"])
    assert bool(jnp.allclose(pred, ref, atol=2e-2)), float(jnp.max(jnp.abs(pred - ref)))

    print("KERNEL_OK")
</pallas_src>

<mosaic_0001>
module attributes {stable_mosaic.version = 11 : i64} {
  func.func @_myresnext_kernel(%arg0: memref<2x4x256xf32, #tpu.memory_space<vmem>>, %arg1: memref<4x1000xbf16, #tpu.memory_space<vmem>>, %arg2: memref<1x1000xf32, #tpu.memory_space<vmem>>, %arg3: memref<1000x100xbf16, #tpu.memory_space<vmem>>, %arg4: memref<1x100xf32, #tpu.memory_space<vmem>>, %arg5: memref<100x128xbf16, #tpu.memory_space<vmem>>, %arg6: memref<1x128xf32, #tpu.memory_space<vmem>>, %arg7: memref<2x128xf32, #tpu.memory_space<vmem>>) attributes {dimension_semantics = [], scalar_prefetch = 0 : i64, scratch_operands = 0 : i64, tpu.core_type = #tpu.core_type<tc>} {
    %c0 = arith.constant 0 : index
    %c0_0 = arith.constant 0 : index
    %c0_1 = arith.constant 0 : index
    %0 = vector.load %arg0[%c0, %c0_0, %c0_1] : memref<2x4x256xf32, #tpu.memory_space<vmem>>, vector<2x4x256xf32>
    %cst = arith.constant dense<0.000000e+00> : vector<2x4xf32>
    %1 = vector.multi_reduction <add>, %0, %cst [2] : vector<2x4x256xf32> to vector<2x4xf32>
    %2 = arith.truncf %1 : vector<2x4xf32> to vector<2x4xbf16>
    %c0_2 = arith.constant 0 : index
    %c0_3 = arith.constant 0 : index
    %3 = vector.load %arg1[%c0_2, %c0_3] : memref<4x1000xbf16, #tpu.memory_space<vmem>>, vector<4x1000xbf16>
    %cst_4 = arith.constant dense<0.000000e+00> : vector<2x1000xf32>
    %4 = tpu.matmul %2, %3, %cst_4 {dimension_numbers = #tpu.dot_dimension_numbers<[1], [0], [0], [1], [0, 0, 1, 1], [], []>} : vector<2x4xbf16>, vector<4x1000xbf16>, vector<2x1000xf32> -> vector<2x1000xf32>
    %c0_5 = arith.constant 0 : index
    %c0_6 = arith.constant 0 : index
    %5 = vector.load %arg2[%c0_5, %c0_6] : memref<1x1000xf32, #tpu.memory_space<vmem>>, vector<1x1000xf32>
    %6 = vector.broadcast %5 : vector<1x1000xf32> to vector<2x1000xf32>
    %7 = arith.addf %4, %6 : vector<2x1000xf32>
    %8 = arith.truncf %7 : vector<2x1000xf32> to vector<2x1000xbf16>
    %c0_7 = arith.constant 0 : index
    %c0_8 = arith.constant 0 : index
    %9 = vector.load %arg3[%c0_7, %c0_8] : memref<1000x100xbf16, #tpu.memory_space<vmem>>, vector<1000x100xbf16>
    %cst_9 = arith.constant dense<0.000000e+00> : vector<2x100xf32>
    %10 = tpu.matmul %8, %9, %cst_9 {dimension_numbers = #tpu.dot_dimension_numbers<[1], [0], [0], [1], [0, 0, 1, 1], [], []>} : vector<2x1000xbf16>, vector<1000x100xbf16>, vector<2x100xf32> -> vector<2x100xf32>
    %c0_10 = arith.constant 0 : index
    %c0_11 = arith.constant 0 : index
    %11 = vector.load %arg4[%c0_10, %c0_11] : memref<1x100xf32, #tpu.memory_space<vmem>>, vector<1x100xf32>
    %12 = vector.broadcast %11 : vector<1x100xf32> to vector<2x100xf32>
    %13 = arith.addf %10, %12 : vector<2x100xf32>
    %cst_12 = arith.constant 0.000000e+00 : f32
    %14 = vector.broadcast %cst_12 : f32 to vector<2x100xf32>
    %15 = arith.maximumf %13, %14 : vector<2x100xf32>
    %16 = arith.truncf %15 : vector<2x100xf32> to vector<2x100xbf16>
    %c0_13 = arith.constant 0 : index
    %c0_14 = arith.constant 0 : index
    %17 = vector.load %arg5[%c0_13, %c0_14] : memref<100x128xbf16, #tpu.memory_space<vmem>>, vector<100x128xbf16>
    %cst_15 = arith.constant dense<0.000000e+00> : vector<2x128xf32>
    %18 = tpu.matmul %16, %17, %cst_15 {dimension_numbers = #tpu.dot_dimension_numbers<[1], [0], [0], [1], [0, 0, 1, 1], [], []>} : vector<2x100xbf16>, vector<100x128xbf16>, vector<2x128xf32> -> vector<2x128xf32>
    %c0_16 = arith.constant 0 : index
    %c0_17 = arith.constant 0 : index
    %19 = vector.load %arg6[%c0_16, %c0_17] : memref<1x128xf32, #tpu.memory_space<vmem>>, vector<1x128xf32>
    %20 = vector.broadcast %19 : vector<1x128xf32> to vector<2x128xf32>
    %21 = arith.addf %18, %20 : vector<2x128xf32>
    %22 = arith.negf %21 : vector<2x128xf32>
    %23 = math.exp %22 : vector<2x128xf32>
    %cst_18 = arith.constant 1.000000e+00 : f32
    %24 = vector.broadcast %cst_18 : f32 to vector<2x128xf32>
    %25 = arith.addf %24, %23 : vector<2x128xf32>
    %26 = arith.divf %24, %25 : vector<2x128xf32>
    %c0_19 = arith.constant 0 : index
    %c0_20 = arith.constant 0 : index
    %27 = vector.load %arg7[%c0_19, %c0_20] : memref<2x128xf32, #tpu.memory_space<vmem>>, vector<2x128xf32>
    tpu.vector_store %arg7[%c0_19, %c0_20], %26 {strides = array<i32>} : memref<2x128xf32, #tpu.memory_space<vmem>>, vector<2x128xf32>,
    return
  }
}

</mosaic_0001>

<bundles_post_ra>
// kernel: myresnext50_forward.1
= control target key start
LH: loop header
LB: loop body
LE: loop exit
PB: predicated region body
PF: predicated region fallthrough
CT: control target
= control target key end

     0   :  { %vm36_vm0 = vcmask 1043456   ;;  %v53_v2 = vlaneseq  ;;  %v1432_v12 = vmov 1983009808   ;;  %vm150_vm1 = vcmask 1041408   ;;  %s1782_s0 = inlined_call_operand.vmem [shape: f32[2,4,256], index: 0, kind: input, shape index: {}]   ;;  %s1783_s1 = inlined_call_operand.vmem [shape: bf16[4,1000], index: 1, kind: input, shape index: {}]   ;;  %s1784_s2 = inlined_call_operand.vmem [shape: f32[1,1000], index: 2, kind: input, shape index: {}]   ;;  %s1785_s3 = inlined_call_operand.vmem [shape: bf16[1000,100], index: 3, kind: input, shape index: {}]   ;;  %s1786_s4 = inlined_call_operand.vmem [shape: f32[1,100], index: 4, kind: input, shape index: {}]   ;;  %s1787_s5 = inlined_call_operand.vmem [shape: bf16[100,128], index: 5, kind: input, shape index: {}]   ;;  %s1788_s6 = inlined_call_operand.vmem [shape: f32[1,128], index: 6, kind: input, shape index: {}]   ;;  %s1789_s7 = inlined_call_operand.hbm [shape: f32[2,128], index: 7, kind: output, shape index: {}]  }
   0x1   :  { %v28_v0 = vld [vmem:[%s1782_s0] sm:$0xff]  ;;  %v29_v1 = vld [vmem:[%s1782_s0 + $0x8] sm:$0xff]  ;;  %v114_v13 = vunpack.c.l.s4 %v1432_v12  ;;  %v1433_v26 = vmov 0  }
   0x2   :  { %v32_v3 = vcombine.high %v28_v0, %v28_v0  ;;  %v37_v4 = vsel %vm36_vm0, %v28_v0, 0.0  ;;  %v33_v5 = vcombine.high %v29_v1, %v29_v1  ;;  %v42_v6 = vsel %vm36_vm0, %v29_v1, 0.0  ;;  %v49_v15 = vld [vmem:[%s1783_s1] sm:$0xff]  ;;  %v50_v24 = vld [vmem:[%s1783_s1 + $0x8] sm:$0xff]  ;;  %207 = vmatprep.mubr.bf16.mxu0 %v1433_v26  ;;  %248 = vmatprep.mubr.bf16.mxu1 %v1433_v26 }
   0x3   :  { %v1485_v7 = vshrl.u32 %v53_v2, 7  ;;  %v115_v14 = vunpack.c.0.s8 %v114_v13  ;;  %v112_v17 = vcombine.high %v49_v15, %v49_v15  ;;  %v129_v25 = vcombine.high %v50_v24, %v50_v24 }
   0x4   :  { %v38_v8 = vsel %vm36_vm0, %v32_v3, 0.0  ;;  %v43_v9 = vsel %vm36_vm0, %v33_v5, 0.0 }
   0x5   :  { %v39_v10 = vadd.f32 %v38_v8, %v37_v4  ;;  %v44_v11 = vadd.f32 %v43_v9, %v42_v6  ;;  %v118_v16 = vsub.s32 %v115_v14, %v1485_v7 }
   0x7   :  { %40 = vadd.xlane.f32.xlu0 %v39_v10  ;;  %v119_v18 = vrot.slane %v49_v15, %v118_v16  ;;  %v126_v19 = vrot.slane %v112_v17, %v118_v16  ;;  %v136_v27 = vrot.slane %v50_v24, %v118_v16  ;;  %v143_v28 = vrot.slane %v129_v25, %v118_v16 }
   0x9   :  { %v127_v20 = vcombine.high %v119_v18, %v119_v18  ;;  %v128_v21 = vcombine.high %v126_v19, %v126_v19  ;;  %v152_v22 = vsel %vm150_vm1, %v119_v18, 0  ;;  %v158_v23 = vsel %vm150_vm1, %v126_v19, 0 }
   0xa   :  { %v144_v29 = vcombine.high %v136_v27, %v136_v27  ;;  %v145_v30 = vcombine.high %v143_v28, %v143_v28 }
   0xb   :  { %45 = vadd.xlane.f32.xlu0 %v44_v11  ;;  %1150 = vmatprep.subr.msk.bf16.mxu0 %vm150_vm1, %v127_v20 }
   0xc   :  { %1152 = vmatprep.subr.msk.bf16.mxu1 %vm150_vm1, %v128_v21  ;;  %176 = vmatpush1.bf16.msra.mxu0 %v152_v22 }
   0xd   :  { %217 = vmatpush1.bf16.msra.mxu1 %v158_v23  ;;  %1154 = vmatprep.subr.msk.bf16.mxu0 %vm150_vm1, %v144_v29 }
   0xe   :  { %1156 = vmatprep.subr.msk.bf16.mxu1 %vm150_vm1, %v145_v30 }
   0xf   :  { %12 = vsyncpa [#allocation3], 0  ;;  %v98_v32 = vand.u32 127, %v53_v2  ;;  %vm107_vm2 = vcmask 1041409   ;;  %vm146_vm3 = vcmask 31744   ;;  %v164_v43 = vsel %vm150_vm1, %v136_v27, 0 }
  0x10   :  { %v170_v44 = vsel %vm150_vm1, %v143_v28, 0  ;;  %v1334_v45 = vld [vmem:[%s1785_s3 + $0x40] sm:$0xff]   ;;  %v1338_v49 = vld [vmem:[%s1785_s3 + $0x48] sm:$0xff]   ;;  %v1342_v53 = vld [vmem:[%s1785_s3 + $0x50] sm:$0xff]   ;;  %v55_v15 = vsub.s32 0, %v1485_v7  ;;  %v63_v16 = vsub.s32 2, %v1485_v7 }
  0x11   :  { %v101_v35 = vsub.s32 %v98_v32, %v1485_v7  ;;  %v1335_v46 = vld [vmem:[%s1785_s3 + $0xc0] sm:$0xff]   ;;  %v1339_v50 = vld [vmem:[%s1785_s3 + $0xc8] sm:$0xff]   ;;  %v1343_v54 = vld [vmem:[%s1785_s3 + $0xd0] sm:$0xff]   ;;  %v59_v18 = vsub.s32 1, %v1485_v7  ;;  %v67_v19 = vsub.s32 3, %v1485_v7  ;;  %vm854_vm4 = vcmask 850944  }
  0x12   :  { %v1336_v47 = vld [vmem:[%s1785_s3] sm:$0xff]   ;;  %v1340_v51 = vld [vmem:[%s1785_s3 + $0x8] sm:$0xff]   ;;  %v1344_v55 = vld [vmem:[%s1785_s3 + $0x10] sm:$0xff]   ;;  %vm1435_vm5 = vmmov 0   ;;  %vm1082_vm6 = vcmask 818176   ;;  %s1436_s22 = smov [#allocation2]  }
  0x13   :  { %v1337_v48 = vld [vmem:[%s1785_s3 + $0x80] sm:$0xff]   ;;  %v1341_v52 = vld [vmem:[%s1785_s3 + $0x88] sm:$0xff]   ;;  %v1345_v56 = vld [vmem:[%s1785_s3 + $0x90] sm:$0xff]   ;;  %s1142_s23 = sshll.u32 %s1436_s22, 4  ;;  %s1143_s23 = int_to_ptr.vmem [resolvable:$true] %s1142_s23 }
  0x14   :  { %v1346_v57 = vld [vmem:[%s1785_s3 + $0x58] sm:$0xff]   ;;  %v1350_v61 = vld [vmem:[%s1785_s3 + $0x60] sm:$0xff]   ;;  %v1354_v1 = vld [vmem:[%s1785_s3 + $0x68] sm:$0xff]   ;;  %s1408_s24 = scalar_lea.vmem %s1143_s23, 32  ;;  %p1413_p1 = scmp.lt.s32.totalorder %s1143_s23, %s1143_s23 }
  0x15   :  { %v1347_v58 = vld [vmem:[%s1785_s3 + $0xd8] sm:$0xff]   ;;  %v1351_v62 = vld [vmem:[%s1785_s3 + $0xe0] sm:$0xff]   ;;  %v1355_v2 = vld [vmem:[%s1785_s3 + $0xe8] sm:$0xff]   ;;  %p1409_p0 = scmp.ne.s32.totalorder %s1143_s23, %s1408_s24  ;;  %p1414_p2 = scmp.lt.s32.totalorder %s1408_s24, %s1408_s24 }
  0x16   :  { %v1348_v59 = vld [vmem:[%s1785_s3 + $0x18] sm:$0xff]   ;;  %v1352_v63 = vld [vmem:[%s1785_s3 + $0x20] sm:$0xff]   ;;  %v1356_v3 = vld [vmem:[%s1785_s3 + $0x28] sm:$0xff]  }
  0x17   :  { %v1349_v60 = vld [vmem:[%s1785_s3 + $0x98] sm:$0xff]   ;;  %v1353_v0 = vld [vmem:[%s1785_s3 + $0xa0] sm:$0xff]   ;;  %v1357_v4 = vld [vmem:[%s1785_s3 + $0xa8] sm:$0xff]   ;;  %p1415_p3 = por %p1414_p2, %p1413_p1 }
  0x18   :  { %v1358_v5 = vld [vmem:[%s1785_s3 + $0x70] sm:$0xff]   ;;  %v1362_v10 = vld [vmem:[%s1785_s3 + $0x78] sm:$0xff]   ;;  %v1366_v14 = vld [vmem:[%s1785_s3 + $0x140] sm:$0xff]  }
  0x19   :  { %v1359_v6 = vld [vmem:[%s1785_s3 + $0xf0] sm:$0xff]   ;;  %v1363_v11 = vld [vmem:[%s1785_s3 + $0xf8] sm:$0xff]   ;;  %v1618_v17 = vld [vmem:[%s1784_s2] sm:$0xff]  ;;  %p1416_p4 = pnand %p1415_p3, %p1409_p0 }
  0x1a   :  { %v1360_v8 = vld [vmem:[%s1785_s3 + $0x30] sm:$0xff]   ;;  %v1364_v12 = vld [vmem:[%s1785_s3 + $0x38] sm:$0xff]   ;;  %v56_v20 = vrot.slane %v1618_v17, %v55_v15  ;;  %v64_v21 = vrot.slane %v1618_v17, %v63_v16  ;;  %v60_v22 = vrot.slane %v1618_v17, %v59_v18  ;;  %v68_v23 = vrot.slane %v1618_v17, %v67_v19 }
  0x1b   :  { %v1361_v9 = vld [vmem:[%s1785_s3 + $0xb0] sm:$0xff]   ;;  %v1365_v13 = vld [vmem:[%s1785_s3 + $0xb8] sm:$0xff]  }
  0x1c   :  { %v1387_v16 = vld [vmem:[%s1785_s3 + $0x178] sm:$0xff]  }
  0x1d   :  { %v1388_v18 = vld [vmem:[%s1785_s3 + $0x138] sm:$0xff]  }
  0x1e   :  { %v1389_v19 = vld [vmem:[%s1785_s3 + $0x1b8] sm:$0xff]  }
  0x94   :  { %v41_v31 = vpop.xlane.xlu0 %40 }
  0x95   :  { %v47_v33 = vpack.c.bf16 %v41_v31, %v41_v31 }
  0x97   :  { %v95_v36 = vunpack.c.l.b16 %v47_v33 }
  0x98   :  { %v46_v34 = vpop.xlane.xlu0 %45 }
  0x99   :  { %v48_v37 = vpack.c.bf16 %v46_v34, %v46_v34  ;;  %v102_v39 = vrot.slane %v95_v36, %v101_v35  ;;  %v83_v36 = vsub.s32 7, %v1485_v7 }
  0x9b   :  { %v96_v38 = vunpack.c.l.b16 %v48_v37 }
  0x9d   :  { %v106_v40 = vrot.slane %v96_v38, %v101_v35  ;;  %v75_v35 = vsub.s32 5, %v1485_v7 }
  0x9f   :  { %v108_v41 = vsel %vm107_vm2, %v106_v40, %v102_v39 }
  0xa0   :  { %v109_v42 = vpack.c.b16 %v108_v41, %v108_v41  ;;  %v1367_v41 = vld [vmem:[%s1785_s3 + $0x100] sm:$0xff]  }
  0xa2   :  { %1151 = vmatmul.mubr.msk.bf16.vlgmr.msra.gmra.mrb[0].mxu0 %vm146_vm3, %v109_v42  ;;  %1153 = vmatmul.mubr.msk.bf16.vlgmr.msra.gmra.mrb[0].mxu1 %vm146_vm3, %v109_v42 }
  0xa3   :  { %258 = vmatpush1.bf16.msra.mxu0 %v164_v43  ;;  %299 = vmatpush1.bf16.msra.mxu1 %v170_v44 }
  0xa4   :  { %289 = vmatprep.mubr.bf16.mxu0 %v1433_v26  ;;  %330 = vmatprep.mubr.bf16.mxu1 %v1433_v26 }
  0xa5   :  { %1233 = vmatprep.subr.bf16.mxu0 %v1334_v45  ;;  %1255 = vmatprep.subr.bf16.mxu1 %v1335_v46  ;;  %v1369_v45 = vld [vmem:[%s1785_s3 + $0x148] sm:$0xff]   ;;  %v76_v46 = vrot.slane %v1618_v17, %v75_v35 }
  0xa6   :  { %v1398_v35 = vld [vmem:[%s1787_s5 + $0x8] sm:$0xff]  }
  0xaa   :  { %1155 = vmatmul.mubr.msk.bf16.vlgmr.msra.gmra.mrb[4].mxu0 %vm146_vm3, %v109_v42  ;;  %1157 = vmatmul.mubr.msk.bf16.vlgmr.msra.gmra.mrb[4].mxu1 %vm146_vm3, %v109_v42  ;;  %v1368_v42 = vld [vmem:[%s1785_s3 + $0x180] sm:$0xff]  }
  0xab   :  { %1234 = vmatpush3.bf16.msra.mxu0 %v1336_v47  ;;  %1256 = vmatpush3.bf16.msra.mxu1 %v1337_v48  ;;  %v84_v47 = vrot.slane %v1618_v17, %v83_v36  ;;  %v1400_v36 = vld [vmem:[%s1787_s5 + $0x18] sm:$0xff]  }
  0xac   :  { %1235 = vmatprep.subr.bf16.mxu0 %v1338_v49  ;;  %1257 = vmatprep.subr.bf16.mxu1 %v1339_v50  ;;  %v1370_v50 = vld [vmem:[%s1785_s3 + $0x108] sm:$0xff]  }
  0xaf   :  { %1236 = vmatpush3.bf16.msra.mxu0 %v1340_v51  ;;  %1258 = vmatpush3.bf16.msra.mxu1 %v1341_v52  ;;  %v1371_v51 = vld [vmem:[%s1785_s3 + $0x188] sm:$0xff]  }
  0xb0   :  { %1237 = vmatprep.subr.bf16.mxu0 %v1342_v53  ;;  %1259 = vmatprep.subr.bf16.mxu1 %v1343_v54  ;;  %v1372_v54 = vld [vmem:[%s1785_s3 + $0x150] sm:$0xff]  }
  0xb3   :  { %1238 = vmatpush3.bf16.msra.mxu0 %v1344_v55  ;;  %1260 = vmatpush3.bf16.msra.mxu1 %v1345_v56 }
  0xb4   :  { %1239 = vmatprep.subr.bf16.mxu0 %v1346_v57  ;;  %1261 = vmatprep.subr.bf16.mxu1 %v1347_v58 }
  0xb7   :  { %1240 = vmatpush3.bf16.msra.mxu0 %v1348_v59  ;;  %1262 = vmatpush3.bf16.msra.mxu1 %v1349_v60 }
  0xb8   :  { %1241 = vmatprep.subr.bf16.mxu0 %v1350_v61  ;;  %1263 = vmatprep.subr.bf16.mxu1 %v1351_v62 }
  0xbb   :  { %1242 = vmatpush3.bf16.msra.mxu0 %v1352_v63  ;;  %1264 = vmatpush3.bf16.msra.mxu1 %v1353_v0  ;;  %v1373_v63 = vld [vmem:[%s1785_s3 + $0x110] sm:$0xff]  }
  0xbc   :  { %1243 = vmatprep.subr.bf16.mxu0 %v1354_v1  ;;  %1265 = vmatprep.subr.bf16.mxu1 %v1355_v2  ;;  %v1374_v0 = vld [vmem:[%s1785_s3 + $0x190] sm:$0xff]   ;;  %v1375_v1 = vld [vmem:[%s1785_s3 + $0x158] sm:$0xff]  }
  0xbd   :  { %v1376_v2 = vld [vmem:[%s1785_s3 + $0x118] sm:$0xff]  }
  0xbf   :  { %1244 = vmatpush3.bf16.msra.mxu0 %v1356_v3  ;;  %1266 = vmatpush3.bf16.msra.mxu1 %v1357_v4  ;;  %v1377_v3 = vld [vmem:[%s1785_s3 + $0x198] sm:$0xff]   ;;  %v1378_v4 = vld [vmem:[%s1785_s3 + $0x160] sm:$0xff]  }
  0xc0   :  { %1245 = vmatprep.subr.bf16.mxu0 %v1358_v5  ;;  %1267 = vmatprep.subr.bf16.mxu1 %v1359_v6  ;;  %v1379_v5 = vld [vmem:[%s1785_s3 + $0x120] sm:$0xff]  }
  0xc1   :  { %v1380_v6 = vld [vmem:[%s1785_s3 + $0x1a0] sm:$0xff]  }
  0xc3   :  { %1246 = vmatpush3.bf16.msra.mxu0 %v1360_v8  ;;  %1268 = vmatpush3.bf16.msra.mxu1 %v1361_v9  ;;  %v1381_v8 = vld [vmem:[%s1785_s3 + $0x168] sm:$0xff]  }
  0xc4   :  { %1247 = vmatprep.subr.bf16.mxu0 %v1362_v10  ;;  %1269 = vmatprep.subr.bf16.mxu1 %v1363_v11  ;;  %v1382_v9 = vld [vmem:[%s1785_s3 + $0x128] sm:$0xff]   ;;  %v71_v11 = vsub.s32 4, %v1485_v7 }
  0xc5   :  { %v1383_v10 = vld [vmem:[%s1785_s3 + $0x1a8] sm:$0xff]  }
  0xc6   :  { %v72_v15 = vrot.slane %v1618_v17, %v71_v11 }
  0xc7   :  { %1248 = vmatpush3.bf16.msra.mxu0 %v1364_v12  ;;  %1270 = vmatpush3.bf16.msra.mxu1 %v1365_v13  ;;  %v1384_v12 = vld [vmem:[%s1785_s3 + $0x170] sm:$0xff]  }
  0xc8   :  { %981 = vmatprep.subr.bf16.mxu1 %v1433_v26  ;;  %1277 = vmatprep.subr.bf16.mxu0 %v1366_v14  ;;  %v1385_v13 = vld [vmem:[%s1785_s3 + $0x130] sm:$0xff]  }
  0xc9   :  { %v1386_v14 = vld [vmem:[%s1785_s3 + $0x1b0] sm:$0xff]  }
 0x175   :  { %v209_v24 = vpop.f32.mrb[0].mxu0  ;;  %v250_v25 = vpop.f32.mrb[0].mxu1 }
 0x176   :  { %v210_v27 = vadd.f32 %v209_v24, %v56_v20  ;;  %v251_v28 = vadd.f32 %v250_v25, %v64_v21  ;;  %v211_v29 = vpop.f32.mrb[1].mxu0  ;;  %v252_v30 = vpop.f32.mrb[1].mxu1  ;;  %v1390_v21 = vld [vmem:[%s1785_s3 + $0x1c0] sm:$0xff]   ;;  %v1392_v24 = vld [vmem:[%s1785_s3 + $0x1d0] sm:$0xff]   ;;  %v1393_v25 = vld [vmem:[%s1785_s3 + $0x1d8] sm:$0xff]  }
 0x177   :  { %v212_v31 = vadd.f32 %v211_v29, %v60_v22  ;;  %v253_v32 = vadd.f32 %v252_v30, %v68_v23  ;;  %v213_v33 = vpop.f32.mrb[2].mxu0  ;;  %v254_v34 = vpop.f32.mrb[2].mxu1  ;;  %v1391_v23 = vld [vmem:[%s1785_s3 + $0x1c8] sm:$0xff]  }
 0x178   :  { %v214_v37 = vpop.f32.mrb[3].mxu0  ;;  %v255_v38 = vpop.f32.mrb[3].mxu1  ;;  %v339_v43 = vpack.c.bf16 %v210_v27, %v210_v27  ;;  %v341_v44 = vpack.c.bf16 %v251_v28, %v251_v28  ;;  %v1394_v27 = vld [vmem:[%s1785_s3 + $0x1e0] sm:$0xff]   ;;  %v79_v28 = vsub.s32 6, %v1485_v7  ;;  %v1395_v29 = vld [vmem:[%s1785_s3 + $0x1e8] sm:$0xff]   ;;  %v1434_v34 = vmov 0.0  }
 0x179   :  { %v340_v39 = vpack.c.bf16 %v212_v31, %v212_v31  ;;  %v342_v40 = vpack.c.bf16 %v253_v32, %v253_v32  ;;  %v1396_v31 = vld [vmem:[%s1785_s3 + $0x1f0] ss:$0 sps:$4 sm:$0xff]   ;;  %v1401_v37 = vld [vmem:[%s1787_s5 + $0x20] sm:$0xff]   ;;  %v1402_v38 = vld [vmem:[%s1787_s5 + $0x28] sm:$0xff]  }
 0x17a   :  { %v80_v30 = vrot.slane %v1618_v17, %v79_v28  ;;  %v859_v7 = vsel %vm36_vm0, %v1396_v31, 0  ;;  %v1397_v17 = vld [vmem:[%s1787_s5] sm:$0xff]  }
 0x17b   :  { %893 = vmatprep.mubr.bf16.mxu0 %v340_v39  ;;  %933 = vmatprep.mubr.bf16.mxu1 %v342_v40  ;;  %v1403_v39 = vld [vmem:[%s1787_s5 + $0x30] ss:$0 sps:$4 sm:$0x33]  }
 0x17c   :  { %894 = vmatmul.mubr.bf16.vlgmr.msra.gmra.mrb[8].mxu0 %v339_v43  ;;  %934 = vmatmul.mubr.bf16.vlgmr.msra.gmra.mrb[8].mxu1 %v341_v44  ;;  %v1087_v40 = vsel %vm150_vm1, %v1403_v39, 0  ;;  %v1158_v43 = vld [vmem:[%s1786_s4] ss:$0 sm:$0xff] }
 0x17d   :  { %1278 = vmatpush3.bf16.msra.mxu0 %v1367_v41  ;;  %982 = vmatpush1.bf16.msra.mxu1 %v1368_v42  ;;  %v291_v48 = vpop.f32.mrb[4].mxu0  ;;  %v1639_v49 = vpop.f32.mrb[4].mxu1 }
 0x17e   :  { %v293_v52 = vpop.f32.mrb[5].mxu0  ;;  %v334_v53 = vpop.f32.mrb[5].mxu1  ;;  %1279 = vmatprep.subr.bf16.mxu0 %v1369_v45  ;;  %983 = vmatprep.subr.bf16.mxu1 %v1433_v26  ;;  %v292_v20 = vadd.f32 %v291_v48, %v72_v15  ;;  %v333_v32 = vadd.f32 %v1639_v49, %v80_v30 }
 0x17f   :  { %v294_v55 = vadd.f32 %v293_v52, %v76_v46  ;;  %v335_v56 = vadd.f32 %v334_v53, %v84_v47  ;;  %v295_v57 = vpop.f32.mrb[6].mxu0  ;;  %v336_v58 = vpop.f32.mrb[6].mxu1 }
 0x180   :  { %v296_v59 = vpop.f32.mrb[7].mxu0  ;;  %v337_v60 = vpop.f32.mrb[7].mxu1  ;;  %v343_v22 = vpack.c.bf16 %v292_v20, %v292_v20  ;;  %v345_v33 = vpack.c.bf16 %v333_v32, %v333_v32 }
 0x181   :  { %v344_v61 = vpack.c.bf16 %v294_v55, %v294_v55  ;;  %v346_v62 = vpack.c.bf16 %v335_v56, %v335_v56  ;;  %1280 = vmatpush3.bf16.msra.mxu0 %v1370_v50  ;;  %984 = vmatpush1.bf16.msra.mxu1 %v1371_v51 }
 0x182   :  { %1281 = vmatprep.subr.bf16.mxu0 %v1372_v54  ;;  %985 = vmatprep.subr.bf16.mxu1 %v1433_v26 }
 0x183   :  { %973 = vmatprep.mubr.bf16.mxu0 %v344_v61  ;;  %1222 = vmatprep.mubr.msk.bf16.mxu1 %vm854_vm4, %v346_v62 }
 0x185   :  { %1282 = vmatpush3.bf16.msra.mxu0 %v1373_v63  ;;  %986 = vmatpush1.bf16.msra.mxu1 %v1374_v0 }
 0x186   :  { %1283 = vmatprep.subr.bf16.mxu0 %v1375_v1  ;;  %987 = vmatprep.subr.bf16.mxu1 %v1433_v26 }
 0x189   :  { %1284 = vmatpush3.bf16.msra.mxu0 %v1376_v2  ;;  %988 = vmatpush1.bf16.msra.mxu1 %v1377_v3  ;;  %v1223_v3 = vld [vmem:[%s1788_s6] ss:$0 sm:$0xff] }
 0x18a   :  { %1285 = vmatprep.subr.bf16.mxu0 %v1378_v4  ;;  %989 = vmatprep.subr.bf16.mxu1 %v1433_v26 }
 0x18d   :  { %1286 = vmatpush3.bf16.msra.mxu0 %v1379_v5  ;;  %990 = vmatpush1.bf16.msra.mxu1 %v1380_v6 }
 0x18e   :  { %1287 = vmatprep.subr.bf16.mxu0 %v1381_v8  ;;  %991 = vmatprep.subr.bf16.mxu1 %v1433_v26 }
 0x191   :  { %1288 = vmatpush3.bf16.msra.mxu0 %v1382_v9  ;;  %992 = vmatpush1.bf16.msra.mxu1 %v1383_v10 }
 0x192   :  { %1289 = vmatprep.subr.bf16.mxu0 %v1384_v12  ;;  %993 = vmatprep.subr.bf16.mxu1 %v1433_v26 }
 0x195   :  { %1290 = vmatpush3.bf16.msra.mxu0 %v1385_v13  ;;  %994 = vmatpush1.bf16.msra.mxu1 %v1386_v14 }
 0x196   :  { %1291 = vmatprep.subr.bf16.mxu0 %v1387_v16  ;;  %995 = vmatprep.subr.bf16.mxu1 %v1433_v26 }
 0x199   :  { %1292 = vmatpush3.bf16.msra.mxu0 %v1388_v18  ;;  %996 = vmatpush1.bf16.msra.mxu1 %v1389_v19 }
 0x19a   :  { %997 = vmatprep.subr.bf16.mxu1 %v1433_v26  ;;  %1307 = vmatprep.subr.bf16.mxu0 %v1434_v34 }
 0x19c   :  { %974 = vmatmul.mubr.bf16.vlgmr.msra.gmra.mrb[12].mxu0 %v343_v22 }
 0x19d   :  { %998 = vmatpush1.bf16.msra.mxu1 %v1390_v21  ;;  %1308 = vmatpush3.bf16.msra.mxu0 %v1397_v17 }
 0x19e   :  { %999 = vmatprep.subr.bf16.mxu1 %v1433_v26  ;;  %1309 = vmatprep.subr.bf16.mxu0 %v1434_v34 }
 0x19f   :  { %1321 = vmatprep.mubr.msk.bf16.mxu0 %vm1435_vm5, %v1434_v34 }
 0x1a1   :  { %1000 = vmatpush1.bf16.msra.mxu1 %v1391_v23  ;;  %1310 = vmatpush3.bf16.msra.mxu0 %v1398_v35 }
 0x1a2   :  { %1001 = vmatprep.subr.bf16.mxu1 %v1433_v26  ;;  %1311 = vmatprep.subr.bf16.mxu0 %v1434_v34 }
 0x1a5   :  { %1002 = vmatpush1.bf16.msra.mxu1 %v1392_v24 }
 0x1a6   :  { %1003 = vmatprep.subr.bf16.mxu1 %v1433_v26 }
 0x1a9   :  { %1004 = vmatpush1.bf16.msra.mxu1 %v1393_v25 }
 0x1aa   :  { %1005 = vmatprep.subr.bf16.mxu1 %v1433_v26 }
 0x1ad   :  { %1006 = vmatpush1.bf16.msra.mxu1 %v1394_v27 }
 0x1ae   :  { %1007 = vmatprep.subr.bf16.mxu1 %v1433_v26 }
 0x1b1   :  { %1008 = vmatpush1.bf16.msra.mxu1 %v1395_v29 }
 0x1b2   :  { %1009 = vmatprep.subr.bf16.mxu1 %v1433_v26  ;;  %v1399_v26 = vld [vmem:[%s1787_s5 + $0x10] sm:$0xff]  }
 0x1b3   :  { %1312 = vmatpush3.bf16.msra.mxu0 %v1399_v26 }
 0x1b4   :  { %1313 = vmatprep.subr.bf16.mxu0 %v1434_v34 }
 0x1b5   :  { %1010 = vmatpush1.bf16.msra.mxu1 %v859_v7 }
 0x1b7   :  { %1314 = vmatpush3.bf16.msra.mxu0 %v1400_v36 }
 0x1b8   :  { %1014 = vmatmul.mubr.bf16.vlgmr.msra.gmra.mrb[12].mxu1 %v345_v33  ;;  %1315 = vmatprep.subr.bf16.mxu0 %v1434_v34 }
 0x1bb   :  { %1316 = vmatpush3.bf16.msra.mxu0 %v1401_v37 }
 0x1bc   :  { %1317 = vmatprep.subr.bf16.mxu0 %v1434_v34 }
 0x1bf   :  { %1318 = vmatpush3.bf16.msra.mxu0 %v1402_v38 }
 0x1c0   :  { %1319 = vmatprep.subr.bf16.mxu0 %v1434_v34 }
 0x1c3   :  { %1320 = vmatpush3.bf16.msra.mxu0 %v1087_v40 }
 0x24f   :  { %v1249_v41 = vpop.f32.mrb[8].mxu0  ;;  %v1271_v42 = vpop.f32.mrb[8].mxu1 }
 0x250   :  { %v1250_v44 = vpop.f32.mrb[9].mxu0  ;;  %v1272_v45 = vpop.f32.mrb[9].mxu1 }
 0x251   :  { %v1251_v46 = vadd.f32 %v1250_v44, %v1249_v41  ;;  %v1273_v47 = vadd.f32 %v1272_v45, %v1271_v42  ;;  %v1252_v48 = vpop.f32.mrb[10].mxu0  ;;  %v1274_v49 = vpop.f32.mrb[10].mxu1 }
 0x252   :  { %v1253_v50 = vpop.f32.mrb[11].mxu0  ;;  %v1275_v51 = vpop.f32.mrb[11].mxu1 }
 0x253   :  { %v896_v52 = vadd.f32 %v1251_v46, %v1158_v43 }
 0x255   :  { %v936_v53 = vadd.f32 %v1273_v47, %v896_v52 }
 0x26f   :  { %v1293_v54 = vpop.f32.mrb[12].mxu0 }
 0x270   :  { %v1294_v55 = vpop.f32.mrb[13].mxu0 }
 0x271   :  { %v1295_v56 = vadd.f32 %v1294_v55, %v1293_v54  ;;  %v1296_v57 = vpop.f32.mrb[14].mxu0 }
 0x272   :  { %v1297_v58 = vpop.f32.mrb[15].mxu0 }
 0x273   :  { %v976_v59 = vadd.f32 %v1295_v56, %v936_v53 }
 0x28b   :  { %v1015_v60 = vpop.f32.mrb[12].mxu1 }
 0x28c   :  { %v1016_v61 = vadd.f32 %v1015_v60, %v976_v59  ;;  %v1017_v62 = vpop.f32.mrb[13].mxu1 }
 0x28d   :  { %v1018_v63 = vpop.f32.mrb[14].mxu1 }
 0x28e   :  { %v1021_v0 = vmax.f32 %v1016_v61, 0.0  ;;  %v1019_v1 = vpop.f32.mrb[15].mxu1 }
 0x290   :  { %v1022_v2 = vpack.c.bf16 %v1021_v0, %v1021_v0 }
 0x292   :  { %1322 = vmatmul.mubr.msk.bf16.vlgmr.msra.gmra.mrb[16].mxu0 %vm1082_vm6, %v1022_v2 }
 0x365   :  { %v1123_v4 = vpop.f32.mrb[16].mxu0 }
 0x366   :  { %v1124_v5 = vadd.f32 %v1223_v3, %v1123_v4  ;;  %v1323_v6 = vpop.f32.mrb[17].mxu0 }
 0x367   :  { %v1126_v8 = vpop.f32.mrb[18].mxu0 }
 0x368   :  { %v1232_v9 = vmul.f32 -1.442695, %v1124_v5  ;;  %v1324_v10 = vpop.f32.mrb[19].mxu0 }
 0x36a   :  { %1404 = vpow2.f32 %v1232_v9 }
 0x374   :  { %v1405_v11 = vpop.eup %1404 }
 0x375   :  { %v1132_v12 = vadd.f32 1.0, %v1405_v11 }
 0x377   :  { %1406 = vrcp.f32 %v1132_v12 }
 0x381   :  { %v1407_v13 = vpop.eup %1406 }
 0x382   :  { %1135 = vst [vmem:[#allocation2] sm:$0x3] %v1407_v13 }
 0x383   :  { %1419 = shalt.err (!%p1416_p4)
}
 0x384   :  { %s1420_s25 = scalar_lea.hbm %s1789_s7, 32 }
 0x385   :  { %p1421_p5 = scmp.ne.s32.totalorder %s1789_s7, %s1420_s25  ;;  %p1424_p6 = scmp.lt.u32.totalorder %s1420_s25, %s1789_s7 }
 0x387   :  { %p1426_p7 = pnand %p1424_p6, %p1421_p5 }
 0x389   :  { %1429 = shalt.err (!%p1426_p7)
}
 0x38a   :  { %1145 = dma.vmem_to_hbm [thread:$0]  %s1143_s23, 32, %s1789_s7, [#allocation3]  }
 0x38b   :  { %1430 = dma.done.wait [#allocation3], 32  }
 0x38c   :  { %1431 = vsyncadd [#allocation3], 4294967264 }
 0x38d   :  { %1149 = vsyncpa [#allocation3], 1 }

</bundles_post_ra>
